<compile_context>
chip_gen: v6e
topology: v6e:2x2x1
jax: 0.10.0
libtpu: 0.0.40
codegen_flags: <defaults>
</compile_context>

<pallas_src>
import functools

import jax
import jax.numpy as jnp
from jax.experimental import pallas as pl
from jax.experimental.pallas import tpu as pltpu


# --------------------------------------------------------------------------
# Pallas kernel: one im2col matmul + folded-BN bias + ReLU
# --------------------------------------------------------------------------
def _concat_conv_bn_relu_kernel(p_ref, w_ref, b_ref, o_ref):
    # Single MXU matmul on the (already concatenated) patch block; f32 acc.
    acc = jnp.dot(p_ref[...], w_ref[...], preferred_element_type=jnp.float32)
    # BN scale is pre-folded into the weight columns -> epilogue is add + ReLU.
    y = acc + b_ref[...]
    o_ref[...] = jnp.maximum(y, 0.0).astype(o_ref.dtype)


# --------------------------------------------------------------------------
# Wrapper-side layout plumbing
# --------------------------------------------------------------------------
def _im2col_nhwc(x_nhwc, K, S):
    """NHWC -> (N*Ho*Wo, K*K*C) patch matrix, column order (dy, dx, c)."""
    N, H, W, C = x_nhwc.shape
    Ho = (H - K) // S + 1
    Wo = (W - K) // S + 1
    if K == S and H == Ho * K and W == Wo * K:
        # Non-overlapping windows (canonical V-Net down-conv, incl. 1x1):
        # pure reshape/transpose, no pixel duplication, fuses with the
        # upstream cast/transpose/concat into one XLA copy pass.
        p = x_nhwc.reshape(N, Ho, K, Wo, K, C)
        p = jnp.transpose(p, (0, 1, 3, 2, 4, 5))          # (N,Ho,Wo,K,K,C)
    else:
        # TODO(synk): overlapping windows (K > S) duplicate pixels by (K/S)^2.
        cols = []
        for dy in range(K):
            for dx in range(K):
                cols.append(x_nhwc[:, dy:dy + S * Ho:S, dx:dx + S * Wo:S, :])
        p = jnp.concatenate(cols, axis=-1)                # (N,Ho,Wo,K*K*C)
    return p.reshape(N * Ho * Wo, K * K * C)


@functools.partial(jax.jit, static_argnames=("stride", "out_dtype"))
def concat_and_conv_block(x1, x2, x3, params, *, stride,
                          out_dtype=jnp.bfloat16):
    """forward(input1, input2, input3) of ConcatAndConvBlock (eval mode)."""
    S = stride
    Cout, Cin, K, _ = params["w"].shape
    chans = (x1.shape[1], x2.shape[1], x3.shape[1])
    assert sum(chans) == Cin
    N, _, H, W = x1.shape
    Ho = (H - K) // S + 1
    Wo = (W - K) // S + 1
    M = N * Ho * Wo
    KKC = K * K * Cin

    # One fused copy pass: bf16 cast, NCHW->NHWC, channel concat, im2col.
    x_nhwc = jnp.concatenate(
        [jnp.transpose(x.astype(jnp.bfloat16), (0, 2, 3, 1))
         for x in (x1, x2, x3)], axis=-1)                  # (N, H, W, Cin)
    patches = _im2col_nhwc(x_nhwc, K, S)                   # (M, KKC) bf16

    # Fold conv bias + eval-mode BN into the weight (f32) and a single bias.
    eps = 1e-5
    scale = params["gamma"] / jnp.sqrt(params["var"] + eps)          # (Cout,)
    bias = params["beta"] + (params["conv_b"] - params["mean"]) * scale
    w = params["w"] * scale[:, None, None, None]                     # OIHW f32
    w = jnp.transpose(w, (2, 3, 1, 0)).reshape(KKC, Cout)            # (dy,dx,c)xCout

    # Lane-dense output: pad Cout to a multiple of 128 (unmasked stores).
    Cout_pad = ((Cout + 127) // 128) * 128
    if Cout_pad != Cout:
        w = jnp.pad(w, ((0, 0), (0, Cout_pad - Cout)))
        bias = jnp.pad(bias, (0, Cout_pad - Cout))
    w = w.astype(jnp.bfloat16)
    bias = bias.reshape(1, Cout_pad).astype(jnp.float32)

    # M-tile: large (amortize ~0.35us/step), multiple of 16 (bf16 sublanes),
    # capped near M/2 so the parallel grid has >= 2 steps (v7x has 2 TCs).
    TM = 1024
    tm_half = ((pl.cdiv(M, 2) + 15) // 16) * 16
    TM = max(16, min(TM, tm_half))
    M_pad = pl.cdiv(M, TM) * TM
    if M_pad != M:
        patches = jnp.pad(patches, ((0, M_pad - M), (0, 0)))

    # VMEM budget from the actual block footprint (double-buffered), with
    # headroom; stays well under v7x's 64 MiB per-TC VMEM.
    out_isz = jnp.dtype(out_dtype).itemsize
    blk_bytes = (2 * TM * KKC * 2            # patch blocks (bf16, 2 buffers)
                 + 2 * TM * Cout_pad * out_isz
                 + 2 * KKC * Cout_pad * 2    # weight (still double-buffered)
                 + 2 * Cout_pad * 4)         # bias
    vmem_limit = int(min(48 * 1024 * 1024, max(8 * 1024 * 1024, 2 * blk_bytes)))

    out_flat = pl.pallas_call(
        _concat_conv_bn_relu_kernel,
        out_shape=jax.ShapeDtypeStruct((M_pad, Cout_pad), out_dtype),
        grid_spec=pltpu.PrefetchScalarGridSpec(
            num_scalar_prefetch=0,
            grid=(M_pad // TM,),
            in_specs=[
                pl.BlockSpec((TM, KKC), lambda m: (m, 0)),        # patches
                pl.BlockSpec((KKC, Cout_pad), lambda m: (0, 0)),  # folded weight
                pl.BlockSpec((1, Cout_pad), lambda m: (0, 0)),    # folded bias
            ],
            out_specs=pl.BlockSpec((TM, Cout_pad), lambda m: (m, 0)),
        ),
        compiler_params=pltpu.CompilerParams(
            dimension_semantics=("parallel",),
            vmem_limit_bytes=vmem_limit),
    )(patches, w, bias)

    out = out_flat[:M, :Cout].reshape(N, Ho, Wo, Cout)
    return jnp.transpose(out, (0, 3, 1, 2))                # NHWC -> NCHW


# --------------------------------------------------------------------------
# Synthetic parameters + independent pure-JAX reference
# --------------------------------------------------------------------------
def init_params(key, chans, out_channels, kernel_size):
    Cin = sum(chans)
    keys = jax.random.split(key, 6)
    w = 0.2 * jax.random.normal(
        keys[0], (out_channels, Cin, kernel_size, kernel_size), jnp.float32)
    conv_b = 0.1 * jax.random.normal(keys[1], (out_channels,), jnp.float32)
    gamma = 1.0 + 0.1 * jax.random.normal(keys[2], (out_channels,), jnp.float32)
    beta = 0.1 * jax.random.normal(keys[3], (out_channels,), jnp.float32)
    mean = 0.1 * jax.random.normal(keys[4], (out_channels,), jnp.float32)
    var = jnp.abs(jax.random.normal(keys[5], (out_channels,), jnp.float32)) + 0.5
    return dict(w=w, conv_b=conv_b, gamma=gamma, beta=beta, mean=mean, var=var)


def ref_forward(x1, x2, x3, params, stride):
    """Pure-JAX reference (independent code path, full f32)."""
    x = jnp.concatenate([x1, x2, x3], axis=1)
    y = jax.lax.conv_general_dilated(
        x, params["w"], window_strides=(stride, stride), padding="VALID",
        dimension_numbers=("NCHW", "OIHW", "NCHW"))
    y = y + params["conv_b"][None, :, None, None]
    eps = 1e-5
    scale = (params["gamma"] / jnp.sqrt(params["var"] + eps))[None, :, None, None]
    y = (y - params["mean"][None, :, None, None]) * scale \
        + params["beta"][None, :, None, None]
    return jnp.maximum(y, 0.0)


def _run_case(key, chans, Cout, K, S, H, W, out_dtype):
    k1, k2, k3, kp = jax.random.split(key, 4)
    N = 2
    x1 = jax.random.normal(k1, (N, chans[0], H, W), jnp.float32)
    x2 = jax.random.normal(k2, (N, chans[1], H, W), jnp.float32)
    x3 = jax.random.normal(k3, (N, chans[2], H, W), jnp.float32)
    params = init_params(kp, chans, Cout, K)

    out = concat_and_conv_block(x1, x2, x3, params, stride=S,
                                out_dtype=out_dtype)
    out = jax.block_until_ready(out)

    ref = ref_forward(x1, x2, x3, params, S)
    Ho, Wo = (H - K) // S + 1, (W - K) // S + 1
    assert out.shape == (N, Cout, Ho, Wo), (out.shape, (N, Cout, Ho, Wo))
    out_f32 = out.astype(jnp.float32)
    # bf16 operands / (optionally) bf16 output vs full-f32 reference.
    assert jnp.allclose(out_f32, ref, rtol=5e-2, atol=5e-2), (
        "mismatch vs reference, max abs err = "
        f"{float(jnp.max(jnp.abs(out_f32 - ref)))}")


if __name__ == "__main__":
    key = jax.random.PRNGKey(0)
    k_a, k_b, k_c = jax.random.split(key, 3)

    # size-reduce conv: 2x2 stride 2 (K == S fast im2col path), bf16 output.
    _run_case(k_a, chans=(8, 8, 8), Cout=32, K=2, S=2, H=16, W=16,
              out_dtype=jnp.bfloat16)
    # dim-reduce conv: 1x1 stride 1, f32 output (module-dtype parity).
    _run_case(k_b, chans=(8, 8, 8), Cout=16, K=1, S=1, H=8, W=8,
              out_dtype=jnp.float32)
    # general path (K != S): 2x2 stride 1, bf16 output.
    _run_case(k_c, chans=(4, 8, 4), Cout=32, K=2, S=1, H=16, W=16,
              out_dtype=jnp.bfloat16)

    print("KERNEL_OK")
</pallas_src>

<mosaic_0001>
module attributes {stable_mosaic.version = 11 : i64} {
  func.func @_concat_conv_bn_relu_kernel(%arg0: i32, %arg1: memref<64x96xbf16, #tpu.memory_space<vmem>>, %arg2: memref<96x128xbf16, #tpu.memory_space<vmem>>, %arg3: memref<1x128xf32, #tpu.memory_space<vmem>>, %arg4: memref<64x128xbf16, #tpu.memory_space<vmem>>) attributes {dimension_semantics = [#tpu.dimension_semantics<parallel>], iteration_bounds = array<i64: 2>, scalar_prefetch = 0 : i64, scratch_operands = 0 : i64, tpu.core_type = #tpu.core_type<tc>, window_params = [{transform_indices = @transform_0, window_bounds = array<i64: 64, 96>}, {pipeline_mode = #tpu.pipeline_mode<synchronous>, transform_indices = @transform_1, window_bounds = array<i64: 96, 128>}, {pipeline_mode = #tpu.pipeline_mode<synchronous>, transform_indices = @transform_2, window_bounds = array<i64: 1, 128>}, {transform_indices = @transform_3, window_bounds = array<i64: 64, 128>}]} {
    %c0 = arith.constant 0 : index
    %c0_0 = arith.constant 0 : index
    %0 = vector.load %arg1[%c0, %c0_0] : memref<64x96xbf16, #tpu.memory_space<vmem>>, vector<64x96xbf16>
    %c0_1 = arith.constant 0 : index
    %c0_2 = arith.constant 0 : index
    %1 = vector.load %arg2[%c0_1, %c0_2] : memref<96x128xbf16, #tpu.memory_space<vmem>>, vector<96x128xbf16>
    %cst = arith.constant dense<0.000000e+00> : vector<64x128xf32>
    %2 = tpu.matmul %0, %1, %cst {dimension_numbers = #tpu.dot_dimension_numbers<[1], [0], [0], [1], [0, 0, 1, 1], [], []>} : vector<64x96xbf16>, vector<96x128xbf16>, vector<64x128xf32> -> vector<64x128xf32>
    %c0_3 = arith.constant 0 : index
    %c0_4 = arith.constant 0 : index
    %3 = vector.load %arg3[%c0_3, %c0_4] : memref<1x128xf32, #tpu.memory_space<vmem>>, vector<1x128xf32>
    %4 = vector.broadcast %3 : vector<1x128xf32> to vector<64x128xf32>
    %5 = arith.addf %2, %4 : vector<64x128xf32>
    %cst_5 = arith.constant 0.000000e+00 : f32
    %6 = vector.broadcast %cst_5 : f32 to vector<64x128xf32>
    %7 = arith.maximumf %5, %6 : vector<64x128xf32>
    %8 = arith.truncf %7 : vector<64x128xf32> to vector<64x128xbf16>
    %c0_6 = arith.constant 0 : index
    %c0_7 = arith.constant 0 : index
    %9 = vector.load %arg4[%c0_6, %c0_7] : memref<64x128xbf16, #tpu.memory_space<vmem>>, vector<64x128xbf16>
    tpu.vector_store %arg4[%c0_6, %c0_7], %8 {strides = array<i32>} : memref<64x128xbf16, #tpu.memory_space<vmem>>, vector<64x128xbf16>,
    return
  }
  func.func @transform_0(%arg0: i32) -> (i32, i32) {
    %c0_i32 = arith.constant 0 : i32
    %c0_i32_0 = arith.constant 0 : i32
    return %arg0, %c0_i32 : i32, i32
  }
  func.func @transform_1(%arg0: i32) -> (i32, i32) {
    %c0_i32 = arith.constant 0 : i32
    %c0_i32_0 = arith.constant 0 : i32
    %c0_i32_1 = arith.constant 0 : i32
    return %c0_i32, %c0_i32_0 : i32, i32
  }
  func.func @transform_2(%arg0: i32) -> (i32, i32) {
    %c0_i32 = arith.constant 0 : i32
    %c0_i32_0 = arith.constant 0 : i32
    %c0_i32_1 = arith.constant 0 : i32
    return %c0_i32, %c0_i32_0 : i32, i32
  }
  func.func @transform_3(%arg0: i32) -> (i32, i32) {
    %c0_i32 = arith.constant 0 : i32
    %c0_i32_0 = arith.constant 0 : i32
    return %arg0, %c0_i32 : i32, i32
  }
}

</mosaic_0001>

<bundles_post_ra>
// kernel: concat_and_conv_block.1
= control target key start
LH: loop header
LB: loop body
LE: loop exit
PB: predicated region body
PF: predicated region fallthrough
CT: control target
= control target key end

     0   :  { %8 = vsyncpa [#allocation3], 0  ;;  %s833_s0 = inlined_call_operand.vmem [shape: bf16[128,96], index: 0, kind: input, shape index: {}]   ;;  %s834_s1 = inlined_call_operand.vmem [shape: bf16[96,128], index: 1, kind: input, shape index: {}]   ;;  %s835_s2 = inlined_call_operand.vmem [shape: f32[1,128], index: 2, kind: input, shape index: {}]   ;;  %s836_s3 = inlined_call_operand.hbm [shape: bf16[128,128], index: 3, kind: output, shape index: {}]  }
   0x1   :  { %10 = vsyncpa [#allocation3 + $0x1], 0  ;;  %s703_s12 = smov 0   ;;  %s705_s13 = smov 0  }
   0x2   :  { %s707_s14 = smov 0   ;;  %s709_s15 = smov 0  }
   0x3 LB: > { %s724_s16 = sadd.s32 4294967295, %s678_s15   ;;  %s458_s17 = sadd.s32 4294967294, %s678_s15   ;;  %s678_s15 = sphi %s709_s15, %s842_s15   ;;  %s674_s14 = sphi %s707_s14, %s841_s14   ;;  %s670_s13 = sphi %s705_s13, %s840_s13   ;;  %s666_s12 = sphi %s703_s12, %s839_s12  }
   0x4   : > { %s728_s18 = sadd.s32 1, %s678_s15   ;;  %s91_s19 = sadd.s32 1, %s674_s14 }
   0x5   : > { %s88_s20 = ssub.s32 %s678_s15, %s728_s18  ;;  %p101_p0 = scmp.ne.s32.totalorder %s674_s14, %s670_s13 }
   0x6   : > { %p89_p1 = scmp.eq.s32.totalorder %s88_s20, 0  ;;  %p102_p2 = scmp.eq.s32.totalorder %s724_s16, 1 }
   0x7   : > { %p107_p3 = scmp.ne.s32.totalorder %s670_s13, %s666_s12  ;;  %p108_p4 = scmp.eq.s32.totalorder %s458_s17, 1 }
   0x8   : > { %s739_s21 = scalar_select %p89_p1, %s674_s14, %s91_s19  }
   0x9   : > { %p741_p5 = por %p102_p2, %p101_p0  ;;  %p745_p6 = por %p108_p4, %p107_p3 }
   0xa   : > { %p461_p7 = scmp.ge.s32.totalorder %s678_s15, 1  ;;  %p141_p8 = scmp.lt.s32.totalorder %s678_s15, 3 }
   0xc   : > { %p142_p9 = pnand %p461_p7, %p141_p8 }
   0xd   : > { %s463_s26 = sshll.u32 (!%p142_p9), %s724_s16, 3  ;;  %s162_s20 = sand.u32 (!%p142_p9), 1, %s670_s13  }
   0xe   : > { %145 = sbr.rel (%p142_p9) target bundleno = 263 (0x107), region = 32  ;;  %p166_p10 = scmp.lt.s32.totalorder (!%p142_p9), %s463_s26, 15 }
   0xf   : > { %s501_s29 = sshll.u32 (!%p142_p9), %s724_s16, 9  ;;  %s793_s16 = scalar_lea.sflag (!%p142_p9), [#allocation3], %s162_s20 }
  0x10   : > { %s789_s5 = scalar_lea.hbm (!%p142_p9), %s836_s3, %s501_s29  ;;  %s680_s7 = smov (!%p142_p9), [#allocation2]  }
  0x11   : > { %s622_s8 = sshll.u32 (!%p142_p9), %s680_s7, 4  ;;  %s623_s8 = int_to_ptr.vmem [resolvable:$false] %s622_s8 }
  0x13   : > { %v608_v0 = vld [vmem:[%s834_s1 + $0x28] sm:$0xff]   ;;  %v609_v1 = vld [vmem:[%s834_s1 + $0x20] sm:$0xff]   ;;  %s844_s26 = smov (!%p166_p10, %s463_s26), 15  ;;  %v610_v2 = vld [vmem:[%s834_s1 + $0x18] sm:$0xff]   ;;  %vm256_vm0 = vcmask 785408  }
  0x14   : > { %535 = vmatprep.subr.bf16.mxu0 %v608_v0  ;;  %555 = vmatprep.subr.bf16.mxu1 %v608_v0  ;;  %s464_s4 = sshll.u32 %s844_s26, 2  ;;  %v611_v3 = vld [vmem:[%s834_s1 + $0x10] sm:$0xff]   ;;  %v612_v6 = vld [vmem:[%s834_s1 + $0x8] sm:$0xff]   ;;  %v613_v7 = vld [vmem:[%s834_s1] sm:$0xff]   ;;  %s462_s26 = sshll.u32 %s162_s20, 5 }
  0x15   : > { %536 = vmatpush3.bf16.msra.mxu0 %v608_v0  ;;  %561 = vmatpush3.bf16.msra.mxu1 %v608_v0  ;;  %s169_s9 = scalar_lea.vmem %s833_s0, %s464_s4  ;;  %v465_v10 = vld [vmem:[%s835_s2] ss:$0 sm:$0xff]  ;;  %s164_s27 = scalar_lea.vmem [#allocation2], %s462_s26 }
  0x16   : > { %537 = vmatprep.subr.bf16.mxu0 %v609_v1  ;;  %556 = vmatprep.subr.bf16.mxu1 %v609_v1  ;;  %v614_v4 = vld [vmem:[%s169_s9] sm:$0xff]   ;;  %v615_v5 = vld [vmem:[%s169_s9 + $0x10] sm:$0xff]   ;;  %v616_v8 = vld [vmem:[%s169_s9 + $0x8] sm:$0xff]   ;;  %s396_s28 = sshll.u32 %s164_s27, 4  ;;  %s784_s28 = int_to_ptr.vmem [resolvable:$true] %s396_s28 }
  0x17   : > { %547 = vmatprep.mubr.msk.bf16.mxu0 %vm256_vm0, %v614_v4  ;;  %551 = vmatprep.mubr.msk.bf16.mxu1 %vm256_vm0, %v615_v5  ;;  %v617_v9 = vld [vmem:[%s169_s9 + $0x18] sm:$0xff]   ;;  %s618_s6 = scalar_lea.vmem %s784_s28, 512  ;;  %s624_s9 = scalar_lea.vmem %s623_s8, 1024 }
  0x18   : > { %p619_p11 = scmp.ne.s32.totalorder %s784_s28, %s618_s6  ;;  %p625_p0 = scmp.lt.s32.totalorder %s784_s28, %s623_s8 }
  0x19   : > { %538 = vmatpush3.bf16.msra.mxu0 %v609_v1  ;;  %562 = vmatpush3.bf16.msra.mxu1 %v609_v1  ;;  %p626_p1 = scmp.lt.s32.totalorder %s624_s9, %s618_s6 }
  0x1a   : > { %539 = vmatprep.subr.bf16.mxu0 %v610_v2  ;;  %557 = vmatprep.subr.bf16.mxu1 %v610_v2  ;;  %p620_p12 = pnand %p619_p11, %p741_p5 }
  0x1b   : > { %p627_p2 = por %p626_p1, %p625_p0 }
  0x1c   : > { %p621_p13 = pneg %p620_p12 }
  0x1d   : > { %540 = vmatpush3.bf16.msra.mxu0 %v610_v2  ;;  %563 = vmatpush3.bf16.msra.mxu1 %v610_v2 }
  0x1e   : > { %541 = vmatprep.subr.bf16.mxu0 %v611_v3  ;;  %558 = vmatprep.subr.bf16.mxu1 %v611_v3  ;;  %p628_p3 = pnand %p627_p2, %p621_p13 }
  0x21   : > { %542 = vmatpush3.bf16.msra.mxu0 %v611_v3  ;;  %564 = vmatpush3.bf16.msra.mxu1 %v611_v3 }
  0x22   : > { %543 = vmatprep.subr.bf16.mxu0 %v612_v6  ;;  %559 = vmatprep.subr.bf16.mxu1 %v612_v6 }
  0x25   : > { %544 = vmatpush3.bf16.msra.mxu0 %v612_v6  ;;  %565 = vmatpush3.bf16.msra.mxu1 %v612_v6 }
  0x26   : > { %545 = vmatprep.subr.bf16.mxu0 %v613_v7  ;;  %560 = vmatprep.subr.bf16.mxu1 %v613_v7 }
  0x29   : > { %546 = vmatpush3.bf16.msra.mxu0 %v613_v7  ;;  %566 = vmatpush3.bf16.msra.mxu1 %v613_v7 }
  0x2c   : > { %548 = vmatmul.mubr.msk.bf16.vlgmr.msra.gmra.mxu0 %vm256_vm0, %v616_v8  ;;  %552 = vmatmul.mubr.msk.bf16.vlgmr.msra.gmra.mxu1 %vm256_vm0, %v617_v9 }
  0xec   : > { %v549_v11 = vpop.f32.mrf.mxu0  ;;  %v553_v12 = vpop.f32.mrf.mxu1 }
  0xed   : > { %v312_v13 = vadd.f32 %v549_v11, %v465_v10  ;;  %v328_v14 = vadd.f32 %v553_v12, %v465_v10 }
  0xee   : > { %v303_v15 = vpop.f32.mrf.mxu0  ;;  %v319_v16 = vpop.f32.mrf.mxu1 }
  0xef   : > { %v304_v17 = vadd.f32 %v465_v10, %v303_v15  ;;  %v320_v18 = vadd.f32 %v465_v10, %v319_v16  ;;  %v336_v23 = vmax.f32 %v312_v13, 0.0  ;;  %v340_v24 = vmax.f32 %v328_v14, 0.0 }
  0xf0   : > { %v550_v19 = vpop.f32.mrf.mxu0  ;;  %v554_v20 = vpop.f32.mrf.mxu1 }
  0xf1   : > { %v315_v21 = vadd.f32 %v550_v19, %v465_v10  ;;  %v331_v22 = vadd.f32 %v554_v20, %v465_v10  ;;  %v334_v31 = vmax.f32 %v304_v17, 0.0  ;;  %v338_v32 = vmax.f32 %v320_v18, 0.0 }
  0xf2   : > { %v306_v25 = vpop.f32.mrf.mxu0  ;;  %v322_v26 = vpop.f32.mrf.mxu1 }
  0xf3   : > { %v337_v27 = vmax.f32 %v315_v21, 0.0  ;;  %v341_v28 = vmax.f32 %v331_v22, 0.0  ;;  %v307_v29 = vadd.f32 %v465_v10, %v306_v25  ;;  %v323_v30 = vadd.f32 %v465_v10, %v322_v26 }
  0xf5   : > { %v510_v33 = vpack.c.bf16 %v337_v27, %v336_v23  ;;  %v520_v34 = vpack.c.bf16 %v341_v28, %v340_v24  ;;  %v335_v35 = vmax.f32 %v307_v29, 0.0  ;;  %v339_v36 = vmax.f32 %v323_v30, 0.0 }
  0xf7   : > { %522 = vst [vmem:[%s164_s27 + $0x8] sm:$0xff] %v510_v33   ;;  %524 = vst [vmem:[%s164_s27 + $0x18] sm:$0xff] %v520_v34   ;;  %v505_v37 = vpack.c.bf16 %v335_v35, %v334_v31  ;;  %v515_v38 = vpack.c.bf16 %v339_v36, %v338_v32 }
  0xf9   : > { %506 = vst [vmem:[%s164_s27] sm:$0xff] %v505_v37   ;;  %523 = vst [vmem:[%s164_s27 + $0x10] sm:$0xff] %v515_v38  }
  0xfa   : > { %631 = shalt.err (!%p628_p3)
}
  0xfb   : > { %s632_s10 = scalar_lea.hbm %s789_s5, 512  ;;  %s636_s19 = scalar_lea.hbm %s836_s3, 1024 }
  0xfc   : > { %p633_p4 = scmp.ne.s32.totalorder %s789_s5, %s632_s10  ;;  %p637_p9 = scmp.lt.s32.totalorder %s789_s5, %s836_s3 }
  0xfd   : > { %p638_p10 = scmp.lt.s32.totalorder %s636_s19, %s632_s10 }
  0xfe   : > { %p634_p7 = pnand %p633_p4, %p741_p5 }
  0xff   : > { %p639_p11 = por %p638_p10, %p637_p9 }
 0x100   : > { %p635_p8 = pneg %p634_p7 }
 0x102   : > { %p640_p12 = pnand %p639_p11, %p635_p8 }
 0x104   : > { %643 = shalt.err (!%p640_p12)
}
 0x105   : > { %s681_s25 = smov 64   ;;  %s682_s26 = smov 4  }
 0x106   : > { %567 = dma.vmem_to_hbm [thread:$0]  (%p741_p5), %s784_s28, 512, %s789_s5, %s793_s16, %s681_s25, %s681_s25, %s682_s26  }
 0x107 PF: > { %p573_p13 = scmp.ge.s32.totalorder %s678_s15, 2  ;;  %s411_s27 = sand.u32 1, %s666_s12  }
 0x108   : > { %s412_s29 = scalar_lea.sflag [#allocation3], %s411_s27 }
 0x109   : > { %p570_p0 = pnand %p573_p13, %p745_p6 }
 0x10b   : > { %p571_p1 = pneg %p570_p0 }
 0x10d   : > { %661 = dma.done.wait (%p571_p1), %s412_s29, 512  }
 0x10e   : > { %663 = vsyncadd (%p571_p1), %s412_s29, 4294966784  ;;  %p13_p2 = scmp.ge.s32.totalorder %s728_s18, 4   ;;  %s839_s12 = smov %s670_s13 }
 0x10f   : > { %s840_s13 = smov %s674_s14  ;;  %s841_s14 = smov %s739_s21 }
 0x110   : > { %s842_s15 = smov %s728_s18  ;;  %15 = sbr.rel (!%p13_p2) target bundleno = 3 (0x3), region = 67 }
 0x115   :  { %417 = vsyncpa [#allocation3], 1 }
 0x116   :  { %419 = vsyncpa [#allocation3 + $0x1], 1 }

</bundles_post_ra>
